<compile_context>
chip_gen: v7x
topology: tpu7x:2x2x1
jax: 0.10.0
libtpu: 0.0.40
codegen_flags: <defaults>
</compile_context>

<pallas_src>
import functools

import jax
import jax.numpy as jnp
from jax.experimental import pallas as pl
from jax.experimental.pallas import tpu as pltpu

A = 0.553

# Module hyper-parameters (N_INPUT must be 1 and N_OUTPUT must be 3 for the
# cat([...], dim=1) boundary transform to make sense).
N_INPUT = 1
N_OUTPUT = 3
N_NEURONS = 32
N_LAYERS = 3          # -> 1 input layer + (N_LAYERS - 1) hidden layers + output layer
OUT_PAD = 8           # output features padded to one full sublane group
BATCH = 1024          # collocation points for the demo
MAX_TILE_B = 4096     # batch-tile cap (multiple of 128); single block below this
LANE = 128


def pinn_kernel(t_ref, cols_ref, wh_ref, head_ref, out_ref):
    """Lane-dense PINN forward for one batch tile.

    t_ref    : (1, TB)               input times, batch on the lane axis
    cols_ref : (H, 1+1+(L-1)) f32    packed columns [wi | bi | bh_0 .. bh_{L-2}]
    wh_ref   : (L-1, H, H)           hidden weights (f32 or bf16)
    head_ref : (OUT_PAD, H+2) f32    packed head [wo | bo | sgn], rows 3..7 zero
    out_ref  : (OUT_PAD, TB) f32     transformed output (rows 3..7 zeros)
    """
    t = t_ref[...]                                      # (1, TB)
    cols = cols_ref[...]                                # (H, L+1)

    # fci: Linear(1 -> H) + tanh.  K=1 matmul -> pure VPU broadcast multiply.
    h = jnp.tanh(cols[:, 0:1] * t + cols[:, 1:2])       # (H, TB) f32

    # fch: (N_LAYERS - 1) x (Linear + tanh), statically unrolled MXU matmuls.
    # Matmul inputs optionally bf16; accumulation + bias + tanh stay f32.
    for l in range(wh_ref.shape[0]):
        w = wh_ref[l]                                   # (H, H)
        z = jnp.dot(w, h.astype(w.dtype), preferred_element_type=jnp.float32)
        h = jnp.tanh(z + cols[:, 2 + l:3 + l])          # (H, TB) f32

    # fco: Linear(H -> 3), padded to 8 output rows (extra rows are zeros).
    head = head_ref[...]                                # (8, H+2) f32
    wo = head[:, :N_NEURONS]                            # (8, H)
    bo = head[:, N_NEURONS:N_NEURONS + 1]               # (8, 1)
    sgn = head[:, N_NEURONS + 1:N_NEURONS + 2]          # (8, 1) = [1, 1, -A, 0, ...]
    xyz = jnp.dot(wo, h, preferred_element_type=jnp.float32) + bo   # (8, TB)

    # Boundary-condition transform:  g + phi * xyz
    #   g   = (2t - 1) * [1, 1, -A]
    #   phi = t * (1 - t)
    g = (2.0 * t - 1.0) * sgn                           # (1,TB)*(8,1) -> (8,TB)
    out_ref[...] = g + (t * (1.0 - t)) * xyz


def pinn_forward(t, wi, bi, wh, bh, wo, bo, *, max_tile_b=MAX_TILE_B,
                 use_bf16=True, transpose_output=True):
    """t: (B, 1) f32 -> (B, 3) f32 (or lane-dense (3, B) if transpose_output=False)."""
    B = t.shape[0]

    # Pick the batch tile: one block when it fits, else MAX_TILE_B tiles.
    b_aligned = pl.cdiv(B, LANE) * LANE
    if b_aligned <= max_tile_b:
        tile_b = b_aligned
    else:
        tile_b = max_tile_b
        b_aligned = pl.cdiv(B, tile_b) * tile_b
    n_blocks = b_aligned // tile_b

    # Lane-dense (1, B) view of t; (B, 1) -> (1, B) is a pure reshape (no copy).
    t2 = t.reshape(1, B)
    if b_aligned != B:
        t2 = jnp.pad(t2, ((0, 0), (0, b_aligned - B)))

    # Pack per-neuron column parameters: [wi | bi | bh_0 | ... | bh_{L-2}]  (H, L+1).
    cols = jnp.concatenate([wi, bi, bh[:, :, 0].T], axis=1).astype(jnp.float32)

    # Pack the output head: [wo | bo | sgn], feature rows padded 3 -> 8.  (8, H+2).
    sgn = jnp.array([[1.0], [1.0], [-A]], jnp.float32)
    head = jnp.concatenate([wo, bo, sgn], axis=1).astype(jnp.float32)
    head = jnp.pad(head, ((0, OUT_PAD - N_OUTPUT), (0, 0)))

    # Hidden weights: bf16 inputs (f32 accumulation) cut MXU pass count ~3x.
    wh_k = wh.astype(jnp.bfloat16) if use_bf16 else wh.astype(jnp.float32)

    out = pl.pallas_call(
        pinn_kernel,
        out_shape=jax.ShapeDtypeStruct((OUT_PAD, b_aligned), jnp.float32),
        grid=(n_blocks,),
        in_specs=[
            pl.BlockSpec((1, tile_b), lambda i: (0, i)),        # t tile
            pl.BlockSpec(cols.shape, lambda i: (0, 0)),         # VMEM-resident
            pl.BlockSpec(wh_k.shape, lambda i: (0, 0, 0)),      # VMEM-resident
            pl.BlockSpec(head.shape, lambda i: (0, 0)),         # VMEM-resident
        ],
        out_specs=pl.BlockSpec((OUT_PAD, tile_b), lambda i: (0, i)),
        compiler_params=pltpu.CompilerParams(
            dimension_semantics=("parallel",) if n_blocks > 1 else ("arbitrary",)),
    )(t2, cols, wh_k, head)

    xyz = out[:N_OUTPUT, :B]                                    # (3, B)
    return xyz.T if transpose_output else xyz


def init_params(key):
    """Deterministic synthetic parameters in PyTorch nn.Linear layout/scale."""
    keys = jax.random.split(key, 2 * (N_LAYERS + 1))

    def lin(kw, kb, fan_in, fan_out):
        bound = 1.0 / jnp.sqrt(jnp.float32(fan_in))
        w = jax.random.uniform(kw, (fan_out, fan_in), jnp.float32, -bound, bound)
        b = jax.random.uniform(kb, (fan_out, 1), jnp.float32, -bound, bound)
        return w, b

    wi, bi = lin(keys[0], keys[1], N_INPUT, N_NEURONS)
    whs, bhs = [], []
    for l in range(N_LAYERS - 1):
        w, b = lin(keys[2 + 2 * l], keys[3 + 2 * l], N_NEURONS, N_NEURONS)
        whs.append(w)
        bhs.append(b)
    wh = jnp.stack(whs, axis=0)            # (L-1, H, H)
    bh = jnp.stack(bhs, axis=0)            # (L-1, H, 1)
    wo, bo = lin(keys[-2], keys[-1], N_NEURONS, N_OUTPUT)
    return wi, bi, wh, bh, wo, bo


def pinn_reference(t, wi, bi, wh, bh, wo, bo):
    """Pure-JAX reference mirroring the PyTorch forward (batch, feature layout)."""
    h = jnp.tanh(t @ wi.T + bi.T)
    for l in range(wh.shape[0]):
        h = jnp.tanh(h @ wh[l].T + bh[l].T)
    xyz = h @ wo.T + bo.T
    g = jnp.concatenate([2 * t - 1, 2 * t - 1, -(2 * t - 1) * A], axis=1)
    phi = jnp.concatenate([t * (1 - t)] * 3, axis=1)
    return g + phi * xyz


if __name__ == "__main__":
    key = jax.random.PRNGKey(0)
    k_t, k_p = jax.random.split(key)

    t = jax.random.uniform(k_t, (BATCH, N_INPUT), jnp.float32)   # times in [0, 1)
    params = init_params(k_p)

    ref = pinn_reference(t, *params)

    fwd_f32 = jax.jit(functools.partial(pinn_forward, use_bf16=False))
    fwd_bf16 = jax.jit(functools.partial(pinn_forward, use_bf16=True))

    # f32 path: exact-precision check against the reference.
    out_f32 = jax.block_until_ready(fwd_f32(t, *params))
    assert out_f32.shape == (BATCH, N_OUTPUT)
    assert jnp.allclose(out_f32, ref, atol=1e-5, rtol=1e-5), \
        float(jnp.max(jnp.abs(out_f32 - ref)))

    # bf16 hidden-matmul path: f32 accumulation, looser tolerance.
    out_bf16 = jax.block_until_ready(fwd_bf16(t, *params))
    assert out_bf16.shape == (BATCH, N_OUTPUT)
    assert jnp.allclose(out_bf16, ref, atol=2e-2, rtol=2e-2), \
        float(jnp.max(jnp.abs(out_bf16 - ref)))

    print("KERNEL_OK")
</pallas_src>

<mosaic_0001>
module attributes {stable_mosaic.version = 11 : i64} {
  func.func @pinn_kernel(%arg0: i32, %arg1: memref<1x1024xf32, #tpu.memory_space<vmem>>, %arg2: memref<32x4xf32, #tpu.memory_space<vmem>>, %arg3: memref<2x32x32xf32, #tpu.memory_space<vmem>>, %arg4: memref<8x34xf32, #tpu.memory_space<vmem>>, %arg5: memref<8x1024xf32, #tpu.memory_space<vmem>>) attributes {dimension_semantics = [#tpu.dimension_semantics<arbitrary>], iteration_bounds = array<i64: 1>, scalar_prefetch = 0 : i64, scratch_operands = 0 : i64, tpu.core_type = #tpu.core_type<tc>, window_params = [{transform_indices = @transform_0, window_bounds = array<i64: 1, 1024>}, {pipeline_mode = #tpu.pipeline_mode<synchronous>, transform_indices = @transform_1, window_bounds = array<i64: 32, 4>}, {pipeline_mode = #tpu.pipeline_mode<synchronous>, transform_indices = @transform_2, window_bounds = array<i64: 2, 32, 32>}, {pipeline_mode = #tpu.pipeline_mode<synchronous>, transform_indices = @transform_3, window_bounds = array<i64: 8, 34>}, {transform_indices = @transform_4, window_bounds = array<i64: 8, 1024>}]} {
    %c0 = arith.constant 0 : index
    %c0_0 = arith.constant 0 : index
    %0 = vector.load %arg1[%c0, %c0_0] : memref<1x1024xf32, #tpu.memory_space<vmem>>, vector<1x1024xf32>
    %c0_1 = arith.constant 0 : index
    %c0_2 = arith.constant 0 : index
    %1 = vector.load %arg2[%c0_1, %c0_2] : memref<32x4xf32, #tpu.memory_space<vmem>>, vector<32x4xf32>
    %2 = vector.extract_strided_slice %1 {offsets = [0, 0], sizes = [32, 1], strides = [1, 1]} : vector<32x4xf32> to vector<32x1xf32>
    %3 = vector.broadcast %2 : vector<32x1xf32> to vector<32x1024xf32>
    %4 = vector.broadcast %0 : vector<1x1024xf32> to vector<32x1024xf32>
    %5 = arith.mulf %3, %4 : vector<32x1024xf32>
    %6 = vector.extract_strided_slice %1 {offsets = [0, 1], sizes = [32, 1], strides = [1, 1]} : vector<32x4xf32> to vector<32x1xf32>
    %7 = vector.broadcast %6 : vector<32x1xf32> to vector<32x1024xf32>
    %8 = arith.addf %5, %7 : vector<32x1024xf32>
    %9 = math.tanh %8 : vector<32x1024xf32>
    %c0_3 = arith.constant 0 : index
    %c0_4 = arith.constant 0 : index
    %c0_5 = arith.constant 0 : index
    %10 = vector.load %arg3[%c0_3, %c0_4, %c0_5] : memref<2x32x32xf32, #tpu.memory_space<vmem>>, vector<1x32x32xf32>
    %11 = vector.shape_cast %10 : vector<1x32x32xf32> to vector<32x32xf32>
    %cst = arith.constant dense<0.000000e+00> : vector<32x1024xf32>
    %12 = tpu.matmul %11, %9, %cst {dimension_numbers = #tpu.dot_dimension_numbers<[1], [0], [0], [1], [0, 0, 1, 1], [], []>} : vector<32x32xf32>, vector<32x1024xf32>, vector<32x1024xf32> -> vector<32x1024xf32>
    %13 = vector.extract_strided_slice %1 {offsets = [0, 2], sizes = [32, 1], strides = [1, 1]} : vector<32x4xf32> to vector<32x1xf32>
    %14 = vector.broadcast %13 : vector<32x1xf32> to vector<32x1024xf32>
    %15 = arith.addf %12, %14 : vector<32x1024xf32>
    %16 = math.tanh %15 : vector<32x1024xf32>
    %c1 = arith.constant 1 : index
    %c0_6 = arith.constant 0 : index
    %c0_7 = arith.constant 0 : index
    %17 = vector.load %arg3[%c1, %c0_6, %c0_7] : memref<2x32x32xf32, #tpu.memory_space<vmem>>, vector<1x32x32xf32>
    %18 = vector.shape_cast %17 : vector<1x32x32xf32> to vector<32x32xf32>
    %cst_8 = arith.constant dense<0.000000e+00> : vector<32x1024xf32>
    %19 = tpu.matmul %18, %16, %cst_8 {dimension_numbers = #tpu.dot_dimension_numbers<[1], [0], [0], [1], [0, 0, 1, 1], [], []>} : vector<32x32xf32>, vector<32x1024xf32>, vector<32x1024xf32> -> vector<32x1024xf32>
    %20 = vector.extract_strided_slice %1 {offsets = [0, 3], sizes = [32, 1], strides = [1, 1]} : vector<32x4xf32> to vector<32x1xf32>
    %21 = vector.broadcast %20 : vector<32x1xf32> to vector<32x1024xf32>
    %22 = arith.addf %19, %21 : vector<32x1024xf32>
    %23 = math.tanh %22 : vector<32x1024xf32>
    %c0_9 = arith.constant 0 : index
    %c0_10 = arith.constant 0 : index
    %24 = vector.load %arg4[%c0_9, %c0_10] : memref<8x34xf32, #tpu.memory_space<vmem>>, vector<8x34xf32>
    %25 = vector.extract_strided_slice %24 {offsets = [0, 0], sizes = [8, 32], strides = [1, 1]} : vector<8x34xf32> to vector<8x32xf32>
    %26 = vector.extract_strided_slice %24 {offsets = [0, 32], sizes = [8, 1], strides = [1, 1]} : vector<8x34xf32> to vector<8x1xf32>
    %27 = vector.extract_strided_slice %24 {offsets = [0, 33], sizes = [8, 1], strides = [1, 1]} : vector<8x34xf32> to vector<8x1xf32>
    %cst_11 = arith.constant dense<0.000000e+00> : vector<8x1024xf32>
    %28 = tpu.matmul %25, %23, %cst_11 {dimension_numbers = #tpu.dot_dimension_numbers<[1], [0], [0], [1], [0, 0, 1, 1], [], []>} : vector<8x32xf32>, vector<32x1024xf32>, vector<8x1024xf32> -> vector<8x1024xf32>
    %29 = vector.broadcast %26 : vector<8x1xf32> to vector<8x1024xf32>
    %30 = arith.addf %28, %29 : vector<8x1024xf32>
    %cst_12 = arith.constant 2.000000e+00 : f32
    %31 = vector.broadcast %cst_12 : f32 to vector<1x1024xf32>
    %32 = arith.mulf %31, %0 : vector<1x1024xf32>
    %cst_13 = arith.constant 1.000000e+00 : f32
    %33 = vector.broadcast %cst_13 : f32 to vector<1x1024xf32>
    %34 = arith.subf %32, %33 : vector<1x1024xf32>
    %35 = vector.broadcast %34 : vector<1x1024xf32> to vector<8x1024xf32>
    %36 = vector.broadcast %27 : vector<8x1xf32> to vector<8x1024xf32>
    %37 = arith.mulf %35, %36 : vector<8x1024xf32>
    %cst_14 = arith.constant 1.000000e+00 : f32
    %38 = vector.broadcast %cst_14 : f32 to vector<1x1024xf32>
    %39 = arith.subf %38, %0 : vector<1x1024xf32>
    %40 = arith.mulf %0, %39 : vector<1x1024xf32>
    %41 = vector.broadcast %40 : vector<1x1024xf32> to vector<8x1024xf32>
    %42 = arith.mulf %41, %30 : vector<8x1024xf32>
    %43 = arith.addf %37, %42 : vector<8x1024xf32>
    %c0_15 = arith.constant 0 : index
    %c0_16 = arith.constant 0 : index
    %44 = vector.load %arg5[%c0_15, %c0_16] : memref<8x1024xf32, #tpu.memory_space<vmem>>, vector<8x1024xf32>
    tpu.vector_store %arg5[%c0_15, %c0_16], %43 {strides = array<i32>} : memref<8x1024xf32, #tpu.memory_space<vmem>>, vector<8x1024xf32>,
    return
  }
  func.func @transform_0(%arg0: i32) -> (i32, i32) {
    %c0_i32 = arith.constant 0 : i32
    %c0_i32_0 = arith.constant 0 : i32
    return %c0_i32, %arg0 : i32, i32
  }
  func.func @transform_1(%arg0: i32) -> (i32, i32) {
    %c0_i32 = arith.constant 0 : i32
    %c0_i32_0 = arith.constant 0 : i32
    %c0_i32_1 = arith.constant 0 : i32
    return %c0_i32, %c0_i32_0 : i32, i32
  }
  func.func @transform_2(%arg0: i32) -> (i32, i32, i32) {
    %c0_i32 = arith.constant 0 : i32
    %c0_i32_0 = arith.constant 0 : i32
    %c0_i32_1 = arith.constant 0 : i32
    %c0_i32_2 = arith.constant 0 : i32
    return %c0_i32, %c0_i32_0, %c0_i32_1 : i32, i32, i32
  }
  func.func @transform_3(%arg0: i32) -> (i32, i32) {
    %c0_i32 = arith.constant 0 : i32
    %c0_i32_0 = arith.constant 0 : i32
    %c0_i32_1 = arith.constant 0 : i32
    return %c0_i32, %c0_i32_0 : i32, i32
  }
  func.func @transform_4(%arg0: i32) -> (i32, i32) {
    %c0_i32 = arith.constant 0 : i32
    %c0_i32_0 = arith.constant 0 : i32
    return %c0_i32, %arg0 : i32, i32
  }
}

</mosaic_0001>

<bundles_post_ra>
// kernel: pinn_forward.1
= control target key start
LH: loop header
LB: loop body
LE: loop exit
PB: predicated region body
PF: predicated region fallthrough
CT: control target
= control target key end

     0   :  { %v1803_v0 = vmov 1   ;;  %v1804_v1 = vmov 0   ;;  %v1805_v6 = vmov 0.0   ;;  %v1806_v7 = vmov 2   ;;  %s2238_s1 = inlined_call_operand.vmem [shape: f32[32,4], index: 1, kind: input, shape index: {}]   ;;  %s2239_s0 = inlined_call_operand.vmem [shape: f32[1,1024], index: 0, kind: input, shape index: {}]   ;;  %s2240_s2 = inlined_call_operand.vmem [shape: f32[2,32,32], index: 2, kind: input, shape index: {}]   ;;  %s2241_s3 = inlined_call_operand.vmem [shape: f32[8,34], index: 3, kind: input, shape index: {}]   ;;  %s2242_s4 = inlined_call_operand.vmem [shape: f32[8,1024], index: 4, kind: output, shape index: {}]  }
   0x1   :  { %1600 = vset.pattern.permute.xlu1 %v1803_v0  ;;  %1599 = vset.pattern.permute.xlu0 %v1804_v1  ;;  %v1838_v2 = vld [vmem:[%s2238_s1] sm:$0xff]  ;;  %v1845_v3 = vld [vmem:[%s2238_s1 + $0x8] sm:$0xff]  ;;  %v1852_v4 = vld [vmem:[%s2238_s1 + $0x10] sm:$0xff]  ;;  %v43_v8 = vlaneseq  ;;  %vm215_vm0 = vcmask 261120  }
   0x2   :  { %116 = vperm.xlu1 %1600, %v1838_v2   ;;  %24 = vperm.xlu0 %1599, %v1838_v2   ;;  %v1857_v5 = vld [vmem:[%s2238_s1 + $0x18] sm:$0xff]  ;;  %v17_v12 = vld [vmem:[%s2239_s0] sm:$0xff] }
   0x3   :  { %292 = vmatprep.mubr.f32.mxu0 %v1805_v6  ;;  %381 = vmatprep.mubr.f32.mxu1 %v1805_v6  ;;  %v44_v9 = vshrl.u32 %v43_v8, 7 }
   0x5   :  { %v1869_v10 = vsub.s32 1, %v44_v9  ;;  %v1871_v11 = vsub.s32 3, %v44_v9  ;;  %v1876_v13 = vsub.s32 0, %v44_v9  ;;  %v1878_v14 = vsub.s32 2, %v44_v9 }
   0x6   :  { %120 = vperm.xlu1 %1600, %v1845_v3   ;;  %29 = vperm.xlu0 %1599, %v1845_v3   ;;  %v1886_v19 = vsub.s32 5, %v44_v9  ;;  %v1921_v43 = vsub.s32 4, %v44_v9  ;;  %v1925_v45 = vsub.s32 7, %v44_v9  ;;  %v1927_v46 = vsub.s32 6, %v44_v9 }
   0x7   :  { %v50_v15 = vrot.slane %v17_v12, %v1869_v10  ;;  %v58_v16 = vrot.slane %v17_v12, %v1871_v11  ;;  %v46_v17 = vrot.slane %v17_v12, %v1876_v13  ;;  %v1884_v18 = vrot.slane %v17_v12, %v1878_v14 }
   0x8   :  { %v1900_v28 = vrot.slane %v17_v12, %v1886_v19  ;;  %v1933_v50 = vrot.slane %v17_v12, %v1921_v43  ;;  %v1940_v54 = vrot.slane %v17_v12, %v1925_v45  ;;  %v1943_v55 = vrot.slane %v17_v12, %v1927_v46 }
   0xa   :  { %1601 = vset.pattern.permute.xlu1 %v1804_v1  ;;  %34 = vperm.xlu0 %1599, %v1852_v4  }
   0xb   :  { %39 = vperm.xlu1 %1601, %v1857_v5  }
   0xe   :  { %1602 = vset.pattern.permute.xlu0 %v1803_v0 }
   0xf   :  { %1603 = vset.pattern.permute.xlu1 %v1803_v0  ;;  %124 = vperm.xlu0 %1602, %v1852_v4  }
  0x10   :  { %128 = vperm.xlu1 %1603, %v1857_v5  }
  0x13   :  { %1605 = vset.pattern.permute.xlu0 %v1806_v7 }
  0x14   :  { %1604 = vset.pattern.permute.xlu1 %v1806_v7  ;;  %204 = vperm.xlu0 %1605, %v1845_v3  }
  0x15   :  { %200 = vperm.xlu1 %1604, %v1838_v2  }
  0x19   :  { %208 = vperm.xlu1 %1604, %v1852_v4  }
  0x1d   :  { %212 = vperm.xlu1 %1604, %v1857_v5  }
  0x81   :  { %v1888_v20 = vpop.permute.xlu1 %116  ;;  %v1890_v21 = vpop.permute.xlu0 %24 }
  0x82   :  { %v84_v22 = vmul.f32 %v50_v15, %v1890_v21  ;;  %v86_v23 = vmul.f32 %v58_v16, %v1890_v21  ;;  %v83_v24 = vmul.f32 %v46_v17, %v1890_v21  ;;  %v85_v25 = vmul.f32 %v1884_v18, %v1890_v21 }
  0x83   :  { %v88_v38 = vmul.f32 %v1900_v28, %v1890_v21 }
  0x84   :  { %v132_v26 = vadd.f32 %v1888_v20, %v84_v22  ;;  %v134_v27 = vadd.f32 %v1888_v20, %v86_v23  ;;  %v131_v31 = vadd.f32 %v1888_v20, %v83_v24  ;;  %v133_v32 = vadd.f32 %v1888_v20, %v85_v25 }
  0x85   :  { %v1902_v29 = vpop.permute.xlu1 %120  ;;  %v1904_v30 = vpop.permute.xlu0 %29  ;;  %v136_v47 = vadd.f32 %v1888_v20, %v88_v38  ;;  %v87_v25 = vmul.f32 %v1933_v50, %v1890_v21 }
  0x86   :  { %v92_v33 = vmul.f32 %v50_v15, %v1904_v30  ;;  %1610 = vtanh.f32 %v132_v26  ;;  %v94_v34 = vmul.f32 %v58_v16, %v1904_v30  ;;  %v91_v35 = vmul.f32 %v46_v17, %v1904_v30 }
  0x87   :  { %1612 = vtanh.f32 %v134_v27  ;;  %v93_v36 = vmul.f32 %v1884_v18, %v1904_v30  ;;  %v96_v8 = vmul.f32 %v1900_v28, %v1904_v30  ;;  %v98_v23 = vmul.f32 %v1940_v54, %v1904_v30 }
  0x88   :  { %v140_v37 = vadd.f32 %v1902_v29, %v92_v33  ;;  %1614 = vtanh.f32 %v131_v31  ;;  %v142_v40 = vadd.f32 %v1902_v29, %v94_v34  ;;  %v139_v41 = vadd.f32 %v1902_v29, %v91_v35 }
  0x89   :  { %v1916_v39 = vpop.permute.xlu0 %34  ;;  %v141_v42 = vadd.f32 %v1902_v29, %v93_v36  ;;  %1616 = vtanh.f32 %v133_v32  ;;  %v144_v32 = vadd.f32 %v1902_v29, %v96_v8  ;;  %v89_v34 = vmul.f32 %v1943_v55, %v1890_v21 }
  0x8a   :  { %v1923_v44 = vpop.permute.xlu1 %39  ;;  %1618 = vtanh.f32 %v140_v37  ;;  %v100_v48 = vmul.f32 %v50_v15, %v1916_v39  ;;  %v102_v49 = vmul.f32 %v58_v16, %v1916_v39  ;;  %v99_v59 = vmul.f32 %v46_v17, %v1916_v39 }
  0x8b   :  { %1620 = vtanh.f32 %v142_v40  ;;  %v108_v52 = vmul.f32 %v50_v15, %v1923_v44  ;;  %v110_v53 = vmul.f32 %v58_v16, %v1923_v44  ;;  %v107_v63 = vmul.f32 %v46_v17, %v1923_v44 }
  0x8c   :  { %1622 = vtanh.f32 %v139_v41  ;;  %v101_v7 = vmul.f32 %v1884_v18, %v1916_v39  ;;  %v109_v15 = vmul.f32 %v1884_v18, %v1923_v44  ;;  %v90_v16 = vmul.f32 %v1940_v54, %v1890_v21 }
  0x8d   :  { %1624 = vtanh.f32 %v141_v42  ;;  %v95_v18 = vmul.f32 %v1933_v50, %v1904_v30  ;;  %v97_v38 = vmul.f32 %v1943_v55, %v1904_v30  ;;  %v146_v41 = vadd.f32 %v1902_v29, %v98_v23 }
  0x8e   :  { %v1935_v51 = vpop.permute.xlu0 %124  ;;  %1626 = vtanh.f32 %v136_v47  ;;  %v138_v36 = vadd.f32 %v1888_v20, %v90_v16  ;;  %v135_v47 = vadd.f32 %v1888_v20, %v87_v25  ;;  %v104_v30 = vmul.f32 %v1900_v28, %v1916_v39 }
  0x8f   :  { %v1945_v56 = vpop.permute.xlu1 %128  ;;  %v148_v57 = vadd.f32 %v1935_v51, %v100_v48  ;;  %v150_v58 = vadd.f32 %v1935_v51, %v102_v49  ;;  %v147_v1 = vadd.f32 %v1935_v51, %v99_v59  ;;  %v149_v22 = vadd.f32 %v1935_v51, %v101_v7 }
  0x90   :  { %v1611_v60 = vpop.eup %1610  ;;  %v156_v61 = vadd.f32 %v1945_v56, %v108_v52  ;;  %v158_v62 = vadd.f32 %v1945_v56, %v110_v53  ;;  %v155_v12 = vadd.f32 %v1945_v56, %v107_v63  ;;  %v157_v26 = vadd.f32 %v1945_v56, %v109_v15 }
  0x91   :  { %v1613_v0 = vpop.eup %1612  ;;  %1628 = vtanh.f32 %v148_v57  ;;  %v143_v21 = vadd.f32 %v1902_v29, %v95_v18  ;;  %v137_v49 = vadd.f32 %v1888_v20, %v89_v34  ;;  %v145_v53 = vadd.f32 %v1902_v29, %v97_v38  ;;  %v196_v34 = vld [vmem:[%s2240_s2 + $0x8] sm:$0xff] }
  0x92   :  { %v1615_v9 = vpop.eup %1614  ;;  %1630 = vtanh.f32 %v156_v61  ;;  %v112_v57 = vmul.f32 %v1900_v28, %v1923_v44  ;;  %v152_v59 = vadd.f32 %v1935_v51, %v104_v30  ;;  %v114_v63 = vmul.f32 %v1940_v54, %v1923_v44 }
  0x93   :  { %v1617_v17 = vpop.eup %1616  ;;  %1632 = vtanh.f32 %v150_v58  ;;  %v103_v29 = vmul.f32 %v1933_v50, %v1916_v39  ;;  %v111_v7 = vmul.f32 %v1933_v50, %v1923_v44 }
  0x94   :  { %v1619_v24 = vpop.eup %1618  ;;  %1634 = vtanh.f32 %v158_v62  ;;  %v160_v20 = vadd.f32 %v1945_v56, %v112_v57 }
  0x95   :  { %v1621_v27 = vpop.eup %1620  ;;  %v1496_v31 = vpack.c.bf16 %v1619_v24, %v1611_v60  ;;  %1636 = vtanh.f32 %v147_v1  ;;  %v106_v60 = vmul.f32 %v1940_v54, %v1916_v39  ;;  %v105_v54 = vmul.f32 %v1943_v55, %v1916_v39  ;;  %v195_v39 = vld [vmem:[%s2240_s2] sm:$0xff] }
  0x96   :  { %v1623_v33 = vpop.eup %1622  ;;  %v1504_v35 = vpack.c.bf16 %v1621_v27, %v1613_v0  ;;  %1638 = vtanh.f32 %v155_v12  ;;  %v151_v15 = vadd.f32 %v1935_v51, %v103_v29  ;;  %v159_v50 = vadd.f32 %v1945_v56, %v111_v7 }
  0x97   :  { %v1625_v37 = vpop.eup %1624  ;;  %1497 = vmatprep.subr.bf16.mxu0 %v1496_v31  ;;  %v1498_v40 = vpack.c.bf16 %v1623_v33, %v1615_v9  ;;  %1640 = vtanh.f32 %v149_v22  ;;  %v154_v28 = vadd.f32 %v1935_v51, %v106_v60  ;;  %v162_v9 = vadd.f32 %v1945_v56, %v114_v63  ;;  %v2054_v60 = vpop.permute.xlu1 %200 }
  0x98   :  { %1505 = vmatprep.subr.bf16.mxu1 %v1504_v35  ;;  %v1506_v42 = vpack.c.bf16 %v1625_v37, %v1617_v17  ;;  %1642 = vtanh.f32 %v157_v26  ;;  %v1627_v48 = vpop.eup %1626  ;;  %v113_v17 = vmul.f32 %v1943_v55, %v1923_v44  ;;  %v153_v24 = vadd.f32 %v1935_v51, %v105_v54 }
  0x99   :  { %1499 = vmatpush1.bf16.msra.mxu0 %v1498_v40  ;;  %1644 = vtanh.f32 %v144_v32 }
  0x9a   :  { %1507 = vmatpush1.bf16.msra.mxu1 %v1506_v42  ;;  %1646 = vtanh.f32 %v138_v36  ;;  %v161_v44 = vadd.f32 %v1945_v56, %v113_v17  ;;  %v197_v42 = vld [vmem:[%s2240_s2 + $0x10] sm:$0xff] }
  0x9b   :  { %v1629_v52 = vpop.eup %1628  ;;  %1648 = vtanh.f32 %v146_v41  ;;  %v2063_v7 = vpop.permute.xlu1 %208 }
  0x9c   :  { %v1631_v58 = vpop.eup %1630  ;;  %1650 = vtanh.f32 %v135_v47 }
  0x9d   :  { %v1633_v61 = vpop.eup %1632  ;;  %v1500_v62 = vpack.c.bf16 %v1631_v58, %v1629_v52  ;;  %1652 = vtanh.f32 %v143_v21 }
  0x9e   :  { %v1635_v0 = vpop.eup %1634  ;;  %1654 = vtanh.f32 %v137_v49 }
  0x9f   :  { %v1637_v1 = vpop.eup %1636  ;;  %1501 = vmatprep.subr.bf16.mxu0 %v1500_v62  ;;  %v1508_v8 = vpack.c.bf16 %v1635_v0, %v1633_v61  ;;  %1656 = vtanh.f32 %v145_v53  ;;  %v198_v53 = vld [vmem:[%s2240_s2 + $0x18] sm:$0xff] }
  0xa0   :  { %v1639_v12 = vpop.eup %1638  ;;  %1658 = vtanh.f32 %v152_v59  ;;  %v1807_v59 = vmov 3  }
  0xa1   :  { %v1641_v16 = vpop.eup %1640  ;;  %1509 = vmatprep.subr.bf16.mxu1 %v1508_v8  ;;  %v1502_v22 = vpack.c.bf16 %v1639_v12, %v1637_v1  ;;  %1660 = vtanh.f32 %v160_v20  ;;  %1607 = vset.pattern.permute.xlu1 %v1807_v59  ;;  %v2059_v1 = vpop.permute.xlu0 %204 }
  0xa2   :  { %v1643_v23 = vpop.eup %1642  ;;  %1662 = vtanh.f32 %v154_v28  ;;  %1606 = vset.pattern.permute.xlu0 %v1807_v59  ;;  %626 = vperm.xlu1 %1607, %v1845_v3  }
  0xa3   :  { %v1645_v25 = vpop.eup %1644  ;;  %1503 = vmatpush1.bf16.msra.mxu0 %v1502_v22  ;;  %v1510_v26 = vpack.c.bf16 %v1643_v23, %v1641_v16  ;;  %1664 = vtanh.f32 %v162_v9  ;;  %622 = vperm.xlu0 %1606, %v1838_v2  }
  0xa4   :  { %v1647_v55 = vpop.eup %1646  ;;  %v1512_v27 = vpack.c.bf16 %v1645_v25, %v1627_v48  ;;  %1666 = vtanh.f32 %v151_v15 }
  0xa5   :  { %v1649_v18 = vpop.eup %1648  ;;  %1511 = vmatpush1.bf16.msra.mxu1 %v1510_v26  ;;  %1668 = vtanh.f32 %v159_v50  ;;  %v2071_v26 = vpop.permute.xlu1 %212 }
  0xa6   :  { %v1651_v31 = vpop.eup %1650  ;;  %1513 = vmatprep.subr.bf16.mxu0 %v1512_v27  ;;  %v1520_v51 = vpack.c.bf16 %v1649_v18, %v1647_v55  ;;  %1455 = vmatmul.mubr.msk.f32.vlgmr.msra.gmra.mrb[0].mxu0 %vm215_vm0, %v195_v39  ;;  %1670 = vtanh.f32 %v153_v24 }
  0xa7   :  { %v1653_v32 = vpop.eup %1652  ;;  %298 = vmatprep.mubr.f32.mxu0 %v1805_v6  ;;  %1672 = vtanh.f32 %v161_v44  ;;  %630 = vperm.xlu1 %1607, %v1852_v4  }
  0xa8   :  { %v1655_v33 = vpop.eup %1654  ;;  %1521 = vmatprep.subr.bf16.mxu1 %v1520_v51  ;;  %1459 = vmatmul.mubr.msk.f32.vlgmr.msra.gmra.mrb[0].mxu1 %vm215_vm0, %v195_v39  ;;  %v1514_v56 = vpack.c.bf16 %v1653_v32, %v1651_v31 }
  0xa9   :  { %v1657_v35 = vpop.eup %1656  ;;  %387 = vmatprep.mubr.f32.mxu1 %v1805_v6  ;;  %634 = vperm.xlu0 %1606, %v1857_v5  }
  0xaa   :  { %v1659_v36 = vpop.eup %1658  ;;  %1515 = vmatpush1.bf16.msra.mxu0 %v1514_v56  ;;  %v1522_v37 = vpack.c.bf16 %v1657_v35, %v1655_v33 }
  0xab   :  { %v1661_v38 = vpop.eup %1660  ;;  %1456 = vmatmul.mubr.msk.f32.gmra.mrb[2].mxu0 %vm215_vm0, %v196_v34 }
  0xac   :  { %v1663_v40 = vpop.eup %1662  ;;  %1523 = vmatpush1.bf16.msra.mxu1 %v1522_v37  ;;  %v1516_v41 = vpack.c.bf16 %v1661_v38, %v1659_v36  ;;  %304 = vmatprep.mubr.f32.mxu0 %v1805_v6 }
  0xad   :  { %v1665_v47 = vpop.eup %1664  ;;  %1460 = vmatmul.mubr.msk.f32.gmra.mrb[2].mxu1 %vm215_vm0, %v196_v34 }
  0xae   :  { %v1667_v21 = vpop.eup %1666  ;;  %1517 = vmatprep.subr.bf16.mxu0 %v1516_v41  ;;  %v1524_v48 = vpack.c.bf16 %v1665_v47, %v1663_v40  ;;  %393 = vmatprep.mubr.f32.mxu1 %v1805_v6 }
  0xaf   :  { %v1669_v49 = vpop.eup %1668  ;;  %1457 = vmatmul.mubr.msk.f32.gmra.mrb[4].mxu0 %vm215_vm0, %v197_v42 }
  0xb0   :  { %v1671_v30 = vpop.eup %1670  ;;  %1525 = vmatprep.subr.bf16.mxu1 %v1524_v48  ;;  %v1518_v52 = vpack.c.bf16 %v1669_v49, %v1667_v21  ;;  %310 = vmatprep.mubr.f32.mxu0 %v1805_v6 }
  0xb1   :  { %v1673_v57 = vpop.eup %1672  ;;  %1461 = vmatmul.mubr.msk.f32.gmra.mrb[4].mxu1 %vm215_vm0, %v197_v42 }
  0xb2   :  { %1519 = vmatpush1.bf16.msra.mxu0 %v1518_v52  ;;  %v1526_v58 = vpack.c.bf16 %v1673_v57, %v1671_v30  ;;  %399 = vmatprep.mubr.f32.mxu1 %v1805_v6 }
  0xb3   :  { %1458 = vmatmul.mubr.msk.f32.gmra.mrb[6].mxu0 %vm215_vm0, %v198_v53 }
  0xb4   :  { %1527 = vmatpush1.bf16.msra.mxu1 %v1526_v58  ;;  %470 = vmatprep.mubr.f32.mxu0 %v1805_v6 }
  0xb5   :  { %1462 = vmatmul.mubr.msk.f32.gmra.mrb[6].mxu1 %vm215_vm0, %v198_v53 }
  0xb6   :  { %559 = vmatprep.mubr.f32.mxu1 %v1805_v6 }
  0xb7   :  { %1463 = vmatmul.mubr.msk.f32.vlgmr.msra.gmra.mrb[8].mxu0 %vm215_vm0, %v195_v39 }
  0xb8   :  { %476 = vmatprep.mubr.f32.mxu0 %v1805_v6 }
  0xb9   :  { %1467 = vmatmul.mubr.msk.f32.vlgmr.msra.gmra.mrb[8].mxu1 %vm215_vm0, %v195_v39 }
  0xba   :  { %565 = vmatprep.mubr.f32.mxu1 %v1805_v6 }
  0xbb   :  { %1464 = vmatmul.mubr.msk.f32.gmra.mrb[10].mxu0 %vm215_vm0, %v196_v34 }
  0xbc   :  { %482 = vmatprep.mubr.f32.mxu0 %v1805_v6 }
  0xbd   :  { %1468 = vmatmul.mubr.msk.f32.gmra.mrb[10].mxu1 %vm215_vm0, %v196_v34 }
  0xbe   :  { %571 = vmatprep.mubr.f32.mxu1 %v1805_v6 }
  0xbf   :  { %1465 = vmatmul.mubr.msk.f32.gmra.mrb[12].mxu0 %vm215_vm0, %v197_v42 }
  0xc0   :  { %488 = vmatprep.mubr.f32.mxu0 %v1805_v6 }
  0xc1   :  { %1469 = vmatmul.mubr.msk.f32.gmra.mrb[12].mxu1 %vm215_vm0, %v197_v42 }
  0xc2   :  { %577 = vmatprep.mubr.f32.mxu1 %v1805_v6 }
  0xc3   :  { %1466 = vmatmul.mubr.msk.f32.gmra.mrb[14].mxu0 %vm215_vm0, %v198_v53 }
  0xc4   :  { %713 = vmatprep.mubr.f32.mxu0 %v1805_v6 }
  0xc5   :  { %1470 = vmatmul.mubr.msk.f32.gmra.mrb[14].mxu1 %vm215_vm0, %v198_v53 }
  0xc6   :  { %802 = vmatprep.mubr.f32.mxu1 %v1805_v6 }
 0x179   :  { %v294_v61 = vpop.f32.mrb[0].mxu0 }
 0x17a   :  { %v295_v62 = vadd.f32 %v294_v61, %v2054_v60  ;;  %v296_v20 = vpop.f32.mrb[1].mxu0 }
 0x17b   :  { %v383_v63 = vpop.f32.mrb[0].mxu1  ;;  %v297_v0 = vadd.f32 %v296_v20, %v2054_v60 }
 0x17c   :  { %v384_v29 = vadd.f32 %v383_v63, %v2054_v60  ;;  %v385_v28 = vpop.f32.mrb[1].mxu1  ;;  %1674 = vtanh.f32 %v295_v62 }
 0x17d   :  { %v386_v2 = vadd.f32 %v385_v28, %v2054_v60  ;;  %1676 = vtanh.f32 %v297_v0 }
 0x17e   :  { %v300_v3 = vpop.f32.mrb[2].mxu0  ;;  %1678 = vtanh.f32 %v384_v29 }
 0x17f   :  { %v301_v4 = vadd.f32 %v300_v3, %v2059_v1  ;;  %v302_v5 = vpop.f32.mrb[3].mxu0  ;;  %1680 = vtanh.f32 %v386_v2 }
 0x180   :  { %v389_v8 = vpop.f32.mrb[2].mxu1  ;;  %v303_v9 = vadd.f32 %v302_v5, %v2059_v1 }
 0x181   :  { %1682 = vtanh.f32 %v301_v4  ;;  %v390_v12 = vadd.f32 %v389_v8, %v2059_v1  ;;  %v391_v54 = vpop.f32.mrb[3].mxu1 }
 0x182   :  { %1684 = vtanh.f32 %v303_v9  ;;  %v392_v15 = vadd.f32 %v391_v54, %v2059_v1  ;;  %v306_v16 = vpop.f32.mrb[4].mxu0 }
 0x183   :  { %1686 = vtanh.f32 %v390_v12  ;;  %v307_v17 = vadd.f32 %v306_v16, %v2063_v7  ;;  %v308_v22 = vpop.f32.mrb[5].mxu0 }
 0x184   :  { %1688 = vtanh.f32 %v392_v15  ;;  %v395_v50 = vpop.f32.mrb[4].mxu1  ;;  %v309_v23 = vadd.f32 %v308_v22, %v2063_v7 }
 0x185   :  { %1690 = vtanh.f32 %v307_v17  ;;  %v396_v24 = vadd.f32 %v395_v50, %v2063_v7  ;;  %v397_v25 = vpop.f32.mrb[5].mxu1 }
 0x186   :  { %1692 = vtanh.f32 %v309_v23  ;;  %v398_v39 = vadd.f32 %v397_v25, %v2063_v7  ;;  %v312_v44 = vpop.f32.mrb[6].mxu0  ;;  %v1675_v55 = vpop.eup %1674 }
 0x187   :  { %1694 = vtanh.f32 %v396_v24  ;;  %v313_v27 = vadd.f32 %v312_v44, %v2071_v26  ;;  %v314_v18 = vpop.f32.mrb[7].mxu0  ;;  %v1677_v31 = vpop.eup %1676 }
 0x188   :  { %1696 = vtanh.f32 %v398_v39  ;;  %v401_v51 = vpop.f32.mrb[6].mxu1  ;;  %v315_v32 = vadd.f32 %v314_v18, %v2071_v26  ;;  %v1679_v33 = vpop.eup %1678 }
 0x189   :  { %1698 = vtanh.f32 %v313_v27  ;;  %v402_v56 = vadd.f32 %v401_v51, %v2071_v26  ;;  %v403_v34 = vpop.f32.mrb[7].mxu1  ;;  %v1681_v35 = vpop.eup %1680 }
 0x18a   :  { %1700 = vtanh.f32 %v315_v32  ;;  %v404_v36 = vadd.f32 %v403_v34, %v2071_v26  ;;  %v472_v37 = vpop.f32.mrb[8].mxu0 }
 0x18b   :  { %v1683_v38 = vpop.eup %1682  ;;  %1702 = vtanh.f32 %v402_v56  ;;  %v473_v40 = vadd.f32 %v472_v37, %v2054_v60  ;;  %v474_v41 = vpop.f32.mrb[9].mxu0 }
 0x18c   :  { %v1685_v42 = vpop.eup %1684  ;;  %1704 = vtanh.f32 %v404_v36  ;;  %v561_v47 = vpop.f32.mrb[8].mxu1  ;;  %v475_v21 = vadd.f32 %v474_v41, %v2054_v60  ;;  %v1530_v48 = vpack.c.bf16 %v1683_v38, %v1675_v55 }
 0x18d   :  { %v1687_v49 = vpop.eup %1686  ;;  %1706 = vtanh.f32 %v473_v40  ;;  %v562_v30 = vadd.f32 %v561_v47, %v2054_v60  ;;  %v563_v52 = vpop.f32.mrb[9].mxu1  ;;  %v1528_v53 = vpack.c.bf16 %v1685_v42, %v1677_v31  ;;  %v1472_v47 = vld [vmem:[%s2240_s2 + $0x28] sm:$0xff] }
 0x18e   :  { %v1689_v57 = vpop.eup %1688  ;;  %1708 = vtanh.f32 %v475_v21  ;;  %v564_v58 = vadd.f32 %v563_v52, %v2054_v60  ;;  %v478_v59 = vpop.f32.mrb[10].mxu0  ;;  %v1538_v61 = vpack.c.bf16 %v1687_v49, %v1679_v33 }
 0x18f   :  { %v1691_v62 = vpop.eup %1690  ;;  %1710 = vtanh.f32 %v562_v30  ;;  %v479_v20 = vadd.f32 %v478_v59, %v2059_v1  ;;  %v480_v63 = vpop.f32.mrb[11].mxu0  ;;  %1529 = vmatprep.subr.bf16.mxu0 %v1528_v53  ;;  %v1536_v0 = vpack.c.bf16 %v1689_v57, %v1681_v35  ;;  %v1471_v35 = vld [vmem:[%s2240_s2 + $0x20] sm:$0xff] }
 0x190   :  { %v1693_v29 = vpop.eup %1692  ;;  %1712 = vtanh.f32 %v564_v58  ;;  %v567_v28 = vpop.f32.mrb[10].mxu1  ;;  %v481_v2 = vadd.f32 %v480_v63, %v2059_v1  ;;  %1531 = vmatpush1.bf16.msra.mxu0 %v1530_v48  ;;  %v1473_v58 = vld [vmem:[%s2240_s2 + $0x30] sm:$0xff]  ;;  %v1474_v63 = vld [vmem:[%s2240_s2 + $0x38] sm:$0xff] }
 0x191   :  { %v1695_v3 = vpop.eup %1694  ;;  %1714 = vtanh.f32 %v479_v20  ;;  %v568_v4 = vadd.f32 %v567_v28, %v2059_v1  ;;  %v569_v60 = vpop.f32.mrb[11].mxu1  ;;  %1537 = vmatprep.subr.bf16.mxu1 %v1536_v0 }
 0x192   :  { %v1697_v5 = vpop.eup %1696  ;;  %1716 = vtanh.f32 %v481_v2  ;;  %v570_v8 = vadd.f32 %v569_v60, %v2059_v1  ;;  %1539 = vmatpush1.bf16.msra.mxu1 %v1538_v61  ;;  %v484_v9 = vpop.f32.mrb[12].mxu0  ;;  %v2141_v60 = vld [vmem:[%s2241_s3] sm:$0xff] }
 0x193   :  { %v1699_v12 = vpop.eup %1698  ;;  %1718 = vtanh.f32 %v568_v4  ;;  %v485_v54 = vadd.f32 %v484_v9, %v2063_v7  ;;  %v486_v15 = vpop.f32.mrb[13].mxu0 }
 0x194   :  { %v1701_v16 = vpop.eup %1700  ;;  %1720 = vtanh.f32 %v570_v8  ;;  %v573_v17 = vpop.f32.mrb[12].mxu1  ;;  %v487_v22 = vadd.f32 %v486_v15, %v2063_v7  ;;  %v1534_v50 = vpack.c.bf16 %v1699_v12, %v1691_v62  ;;  %v1809_v8 = vmov 33  }
 0x195   :  { %v1703_v23 = vpop.eup %1702  ;;  %1722 = vtanh.f32 %v485_v54  ;;  %v574_v24 = vadd.f32 %v573_v17, %v2063_v7  ;;  %v575_v25 = vpop.f32.mrb[13].mxu1  ;;  %v1532_v39 = vpack.c.bf16 %v1701_v16, %v1693_v29  ;;  %1609 = vset.pattern.permute.xlu0 %v1809_v8 }
 0x196   :  { %v1705_v1 = vpop.eup %1704  ;;  %1724 = vtanh.f32 %v487_v22  ;;  %v576_v44 = vadd.f32 %v575_v25, %v2063_v7  ;;  %v490_v55 = vpop.f32.mrb[14].mxu0  ;;  %v1542_v27 = vpack.c.bf16 %v1703_v23, %v1695_v3  ;;  %1373 = vperm.xlu0 %1609, %v2141_v60  }
 0x197   :  { %v1707_v18 = vpop.eup %1706  ;;  %1726 = vtanh.f32 %v574_v24  ;;  %v491_v31 = vadd.f32 %v490_v55, %v2071_v26  ;;  %v492_v51 = vpop.f32.mrb[15].mxu0  ;;  %1533 = vmatprep.subr.bf16.mxu0 %v1532_v39  ;;  %v1540_v32 = vpack.c.bf16 %v1705_v1, %v1697_v5  ;;  %v1808_v5 = vmov 32  }
 0x198   :  { %v1709_v33 = vpop.eup %1708  ;;  %1728 = vtanh.f32 %v576_v44  ;;  %v579_v56 = vpop.f32.mrb[14].mxu1  ;;  %v493_v34 = vadd.f32 %v492_v51, %v2071_v26  ;;  %1535 = vmatpush1.bf16.msra.mxu0 %v1534_v50  ;;  %1608 = vset.pattern.permute.xlu1 %v1808_v5 }
 0x199   :  { %v1711_v7 = vpop.eup %1710  ;;  %1730 = vtanh.f32 %v491_v31  ;;  %v580_v36 = vadd.f32 %v579_v56, %v2071_v26  ;;  %v581_v37 = vpop.f32.mrb[15].mxu1  ;;  %1541 = vmatprep.subr.bf16.mxu1 %v1540_v32  ;;  %1040 = vperm.xlu1 %1608, %v2141_v60  }
 0x19a   :  { %v1713_v38 = vpop.eup %1712  ;;  %1732 = vtanh.f32 %v493_v34  ;;  %v582_v40 = vadd.f32 %v581_v37, %v2071_v26  ;;  %1543 = vmatpush1.bf16.msra.mxu1 %v1542_v27  ;;  %v2145_v9 = vpop.permute.xlu0 %622 }
 0x19b   :  { %v1715_v41 = vpop.eup %1714  ;;  %1734 = vtanh.f32 %v580_v36  ;;  %1475 = vmatmul.mubr.msk.f32.vlgmr.msra.gmra.mrb[16].mxu0 %vm215_vm0, %v1471_v35  ;;  %v2147_v54 = vpop.permute.xlu1 %626 }
 0x19c   :  { %v1717_v42 = vpop.eup %1716  ;;  %1736 = vtanh.f32 %v582_v40  ;;  %719 = vmatprep.mubr.f32.mxu0 %v1805_v6  ;;  %v1546_v21 = vpack.c.bf16 %v1715_v41, %v1707_v18 }
 0x19d   :  { %v1719_v48 = vpop.eup %1718  ;;  %1479 = vmatmul.mubr.msk.f32.vlgmr.msra.gmra.mrb[16].mxu1 %vm215_vm0, %v1471_v35  ;;  %v1544_v49 = vpack.c.bf16 %v1717_v42, %v1709_v33 }
 0x19e   :  { %v1721_v30 = vpop.eup %1720  ;;  %808 = vmatprep.mubr.f32.mxu1 %v1805_v6  ;;  %v1554_v26 = vpack.c.bf16 %v1719_v48, %v1711_v7 }
 0x19f   :  { %v1723_v52 = vpop.eup %1722  ;;  %1476 = vmatmul.mubr.msk.f32.gmra.mrb[18].mxu0 %vm215_vm0, %v1472_v47  ;;  %1545 = vmatprep.subr.bf16.mxu0 %v1544_v49  ;;  %v1552_v53 = vpack.c.bf16 %v1721_v30, %v1713_v38  ;;  %v2155_v27 = vpop.permute.xlu1 %630 }
 0x1a0   :  { %v1725_v57 = vpop.eup %1724  ;;  %1547 = vmatpush1.bf16.msra.mxu0 %v1546_v21  ;;  %725 = vmatprep.mubr.f32.mxu0 %v1805_v6 }
 0x1a1   :  { %v1727_v59 = vpop.eup %1726  ;;  %1480 = vmatmul.mubr.msk.f32.gmra.mrb[18].mxu1 %vm215_vm0, %v1472_v47  ;;  %1553 = vmatprep.subr.bf16.mxu1 %v1552_v53 }
 0x1a2   :  { %v1729_v61 = vpop.eup %1728  ;;  %1555 = vmatpush1.bf16.msra.mxu1 %v1554_v26  ;;  %814 = vmatprep.mubr.f32.mxu1 %v1805_v6 }
 0x1a3   :  { %v1731_v62 = vpop.eup %1730  ;;  %1477 = vmatmul.mubr.msk.f32.gmra.mrb[20].mxu0 %vm215_vm0, %v1473_v58 }
 0x1a4   :  { %v1733_v20 = vpop.eup %1732  ;;  %731 = vmatprep.mubr.f32.mxu0 %v1805_v6  ;;  %v1550_v0 = vpack.c.bf16 %v1731_v62, %v1723_v52 }
 0x1a5   :  { %v1735_v29 = vpop.eup %1734  ;;  %1481 = vmatmul.mubr.msk.f32.gmra.mrb[20].mxu1 %vm215_vm0, %v1473_v58  ;;  %v1548_v28 = vpack.c.bf16 %v1733_v20, %v1725_v57 }
 0x1a6   :  { %v1737_v2 = vpop.eup %1736  ;;  %820 = vmatprep.mubr.f32.mxu1 %v1805_v6  ;;  %v1558_v3 = vpack.c.bf16 %v1735_v29, %v1727_v59 }
 0x1a7   :  { %1478 = vmatmul.mubr.msk.f32.gmra.mrb[22].mxu0 %vm215_vm0, %v1474_v63  ;;  %1549 = vmatprep.subr.bf16.mxu0 %v1548_v28  ;;  %v1556_v4 = vpack.c.bf16 %v1737_v2, %v1729_v61 }
 0x1a8   :  { %1551 = vmatpush1.bf16.msra.mxu0 %v1550_v0  ;;  %891 = vmatprep.mubr.f32.mxu0 %v1805_v6 }
 0x1a9   :  { %1482 = vmatmul.mubr.msk.f32.gmra.mrb[22].mxu1 %vm215_vm0, %v1474_v63  ;;  %1557 = vmatprep.subr.bf16.mxu1 %v1556_v4 }
 0x1aa   :  { %1559 = vmatpush1.bf16.msra.mxu1 %v1558_v3  ;;  %980 = vmatprep.mubr.f32.mxu1 %v1805_v6 }
 0x1ab   :  { %1483 = vmatmul.mubr.msk.f32.vlgmr.msra.gmra.mrb[24].mxu0 %vm215_vm0, %v1471_v35 }
 0x1ac   :  { %897 = vmatprep.mubr.f32.mxu0 %v1805_v6 }
 0x1ad   :  { %1487 = vmatmul.mubr.msk.f32.vlgmr.msra.gmra.mrb[24].mxu1 %vm215_vm0, %v1471_v35  ;;  %v2160_v35 = vpop.permute.xlu0 %634 }
 0x1ae   :  { %986 = vmatprep.mubr.f32.mxu1 %v1805_v6 }
 0x1af   :  { %1484 = vmatmul.mubr.msk.f32.gmra.mrb[26].mxu0 %vm215_vm0, %v1472_v47 }
 0x1b0   :  { %903 = vmatprep.mubr.f32.mxu0 %v1805_v6 }
 0x1b1   :  { %1488 = vmatmul.mubr.msk.f32.gmra.mrb[26].mxu1 %vm215_vm0, %v1472_v47 }
 0x1b2   :  { %992 = vmatprep.mubr.f32.mxu1 %v1805_v6 }
 0x1b3   :  { %1485 = vmatmul.mubr.msk.f32.gmra.mrb[28].mxu0 %vm215_vm0, %v1473_v58 }
 0x1b4   :  { %909 = vmatprep.mubr.f32.mxu0 %v1805_v6 }
 0x1b5   :  { %1489 = vmatmul.mubr.msk.f32.gmra.mrb[28].mxu1 %vm215_vm0, %v1473_v58 }
 0x1b6   :  { %998 = vmatprep.mubr.f32.mxu1 %v1805_v6 }
 0x1b7   :  { %1486 = vmatmul.mubr.msk.f32.gmra.mrb[30].mxu0 %vm215_vm0, %v1474_v63 }
 0x1b8   :  { %1109 = vmatprep.mubr.f32.mxu0 %v1805_v6 }
 0x1b9   :  { %1490 = vmatmul.mubr.msk.f32.gmra.mrb[30].mxu1 %vm215_vm0, %v1474_v63 }
 0x1ba   :  { %1180 = vmatprep.mubr.f32.mxu1 %v1805_v6 }
 0x26e   :  { %v715_v12 = vpop.f32.mrb[16].mxu0 }
 0x26f   :  { %v717_v15 = vpop.f32.mrb[17].mxu0  ;;  %v716_v16 = vadd.f32 %v715_v12, %v2145_v9 }
 0x270   :  { %v804_v17 = vpop.f32.mrb[16].mxu1  ;;  %v718_v22 = vadd.f32 %v717_v15, %v2145_v9 }
 0x271   :  { %v806_v50 = vpop.f32.mrb[17].mxu1  ;;  %1738 = vtanh.f32 %v716_v16  ;;  %v805_v23 = vadd.f32 %v804_v17, %v2145_v9 }
 0x272   :  { %v721_v24 = vpop.f32.mrb[18].mxu0  ;;  %1740 = vtanh.f32 %v718_v22  ;;  %v807_v25 = vadd.f32 %v806_v50, %v2145_v9 }
 0x273   :  { %v723_v39 = vpop.f32.mrb[19].mxu0  ;;  %v722_v1 = vadd.f32 %v721_v24, %v2147_v54  ;;  %1742 = vtanh.f32 %v805_v23 }
 0x274   :  { %v810_v44 = vpop.f32.mrb[18].mxu1  ;;  %v724_v55 = vadd.f32 %v723_v39, %v2147_v54  ;;  %1744 = vtanh.f32 %v807_v25 }
 0x275   :  { %v812_v18 = vpop.f32.mrb[19].mxu1  ;;  %1746 = vtanh.f32 %v722_v1  ;;  %v811_v31 = vadd.f32 %v810_v44, %v2147_v54 }
 0x276   :  { %1748 = vtanh.f32 %v724_v55  ;;  %v813_v51 = vadd.f32 %v812_v18, %v2147_v54  ;;  %v727_v32 = vpop.f32.mrb[20].mxu0 }
 0x277   :  { %v729_v33 = vpop.f32.mrb[21].mxu0  ;;  %1750 = vtanh.f32 %v811_v31  ;;  %v728_v56 = vadd.f32 %v727_v32, %v2155_v27 }
 0x278   :  { %1752 = vtanh.f32 %v813_v51  ;;  %v816_v34 = vpop.f32.mrb[20].mxu1  ;;  %v730_v7 = vadd.f32 %v729_v33, %v2155_v27 }
 0x279   :  { %v818_v36 = vpop.f32.mrb[21].mxu1  ;;  %1754 = vtanh.f32 %v728_v56  ;;  %v817_v37 = vadd.f32 %v816_v34, %v2155_v27 }
 0x27a   :  { %v733_v38 = vpop.f32.mrb[22].mxu0  ;;  %1756 = vtanh.f32 %v730_v7  ;;  %v819_v40 = vadd.f32 %v818_v36, %v2155_v27 }
 0x27b   :  { %v1739_v41 = vpop.eup %1738  ;;  %v735_v42 = vpop.f32.mrb[23].mxu0  ;;  %v734_v47 = vadd.f32 %v733_v38, %v2160_v35  ;;  %1758 = vtanh.f32 %v817_v37 }
 0x27c   :  { %v1741_v21 = vpop.eup %1740  ;;  %v822_v48 = vpop.f32.mrb[22].mxu1  ;;  %v736_v49 = vadd.f32 %v735_v42, %v2160_v35  ;;  %1760 = vtanh.f32 %v819_v40 }
 0x27d   :  { %v1743_v30 = vpop.eup %1742  ;;  %v824_v26 = vpop.f32.mrb[23].mxu1  ;;  %1762 = vtanh.f32 %v734_v47  ;;  %v823_v52 = vadd.f32 %v822_v48, %v2160_v35 }
 0x27e   :  { %v1745_v53 = vpop.eup %1744  ;;  %1764 = vtanh.f32 %v736_v49  ;;  %v825_v57 = vadd.f32 %v824_v26, %v2160_v35  ;;  %v893_v58 = vpop.f32.mrb[24].mxu0 }
 0x27f   :  { %v1747_v59 = vpop.eup %1746  ;;  %v894_v61 = vadd.f32 %v893_v58, %v2145_v9  ;;  %v895_v62 = vpop.f32.mrb[25].mxu0  ;;  %1766 = vtanh.f32 %v823_v52 }
 0x280   :  { %v1749_v20 = vpop.eup %1748  ;;  %1768 = vtanh.f32 %v825_v57  ;;  %v982_v63 = vpop.f32.mrb[24].mxu1  ;;  %v896_v0 = vadd.f32 %v895_v62, %v2145_v9  ;;  %v1562_v29 = vpack.c.bf16 %v1747_v59, %v1739_v41 }
 0x281   :  { %v1751_v28 = vpop.eup %1750  ;;  %1770 = vtanh.f32 %v894_v61  ;;  %v983_v2 = vadd.f32 %v982_v63, %v2145_v9  ;;  %v984_v3 = vpop.f32.mrb[25].mxu1  ;;  %v1560_v4 = vpack.c.bf16 %v1749_v20, %v1741_v21 }
 0x282   :  { %v1753_v5 = vpop.eup %1752  ;;  %1772 = vtanh.f32 %v896_v0  ;;  %v985_v8 = vadd.f32 %v984_v3, %v2145_v9  ;;  %v899_v12 = vpop.f32.mrb[26].mxu0  ;;  %v1570_v15 = vpack.c.bf16 %v1751_v28, %v1743_v30 }
 0x283   :  { %v1755_v16 = vpop.eup %1754  ;;  %1774 = vtanh.f32 %v983_v2  ;;  %v900_v17 = vadd.f32 %v899_v12, %v2147_v54  ;;  %v901_v22 = vpop.f32.mrb[27].mxu0  ;;  %1561 = vmatprep.subr.bf16.mxu0 %v1560_v4  ;;  %v1568_v50 = vpack.c.bf16 %v1753_v5, %v1745_v53 }
 0x284   :  { %v1757_v23 = vpop.eup %1756  ;;  %1776 = vtanh.f32 %v985_v8  ;;  %v988_v24 = vpop.f32.mrb[26].mxu1  ;;  %v902_v25 = vadd.f32 %v901_v22, %v2147_v54  ;;  %1563 = vmatpush1.bf16.msra.mxu0 %v1562_v29 }
 0x285   :  { %v1759_v39 = vpop.eup %1758  ;;  %1778 = vtanh.f32 %v900_v17  ;;  %v989_v1 = vadd.f32 %v988_v24, %v2147_v54  ;;  %v990_v9 = vpop.f32.mrb[27].mxu1  ;;  %1569 = vmatprep.subr.bf16.mxu1 %v1568_v50 }
 0x286   :  { %v1761_v44 = vpop.eup %1760  ;;  %1780 = vtanh.f32 %v902_v25  ;;  %v991_v55 = vadd.f32 %v990_v9, %v2147_v54  ;;  %1571 = vmatpush1.bf16.msra.mxu1 %v1570_v15  ;;  %v905_v18 = vpop.f32.mrb[28].mxu0 }
 0x287   :  { %v1763_v31 = vpop.eup %1762  ;;  %1782 = vtanh.f32 %v989_v1  ;;  %v906_v51 = vadd.f32 %v905_v18, %v2155_v27  ;;  %v907_v32 = vpop.f32.mrb[29].mxu0 }
 0x288   :  { %v1765_v33 = vpop.eup %1764  ;;  %1784 = vtanh.f32 %v991_v55  ;;  %v994_v56 = vpop.f32.mrb[28].mxu1  ;;  %v908_v34 = vadd.f32 %v907_v32, %v2155_v27  ;;  %v1566_v7 = vpack.c.bf16 %v1763_v31, %v1755_v16 }
 0x289   :  { %v1767_v36 = vpop.eup %1766  ;;  %1786 = vtanh.f32 %v906_v51  ;;  %v995_v37 = vadd.f32 %v994_v56, %v2155_v27  ;;  %v996_v38 = vpop.f32.mrb[29].mxu1  ;;  %v1564_v40 = vpack.c.bf16 %v1765_v33, %v1757_v23 }
 0x28a   :  { %v1769_v54 = vpop.eup %1768  ;;  %1788 = vtanh.f32 %v908_v34  ;;  %v997_v41 = vadd.f32 %v996_v38, %v2155_v27  ;;  %v911_v42 = vpop.f32.mrb[30].mxu0  ;;  %v1574_v47 = vpack.c.bf16 %v1767_v36, %v1759_v39 }
 0x28b   :  { %v1771_v21 = vpop.eup %1770  ;;  %1790 = vtanh.f32 %v995_v37  ;;  %v912_v48 = vadd.f32 %v911_v42, %v2160_v35  ;;  %v913_v49 = vpop.f32.mrb[31].mxu0  ;;  %1565 = vmatprep.subr.bf16.mxu0 %v1564_v40  ;;  %v1572_v30 = vpack.c.bf16 %v1769_v54, %v1761_v44 }
 0x28c   :  { %v1773_v26 = vpop.eup %1772  ;;  %1792 = vtanh.f32 %v997_v41  ;;  %v1000_v52 = vpop.f32.mrb[30].mxu1  ;;  %v914_v53 = vadd.f32 %v913_v49, %v2160_v35  ;;  %1567 = vmatpush1.bf16.msra.mxu0 %v1566_v7 }
 0x28d   :  { %v1775_v57 = vpop.eup %1774  ;;  %1794 = vtanh.f32 %v912_v48  ;;  %v1001_v58 = vadd.f32 %v1000_v52, %v2160_v35  ;;  %v1002_v27 = vpop.f32.mrb[31].mxu1  ;;  %1573 = vmatprep.subr.bf16.mxu1 %v1572_v30 }
 0x28e   :  { %v1777_v59 = vpop.eup %1776  ;;  %1796 = vtanh.f32 %v914_v53  ;;  %v1003_v61 = vadd.f32 %v1002_v27, %v2160_v35  ;;  %1575 = vmatpush1.bf16.msra.mxu1 %v1574_v47  ;;  %v1041_v55 = vpop.permute.xlu1 %1040 }
 0x28f   :  { %v1779_v62 = vpop.eup %1778  ;;  %1798 = vtanh.f32 %v1001_v58  ;;  %1491 = vmatmul.mubr.msk.f32.vlgmr.msra.gmra.mrb[32].mxu0 %vm215_vm0, %v2141_v60  ;;  %v1374_v18 = vpop.permute.xlu0 %1373 }
 0x290   :  { %v1781_v20 = vpop.eup %1780  ;;  %1800 = vtanh.f32 %v1003_v61  ;;  %v1578_v63 = vpack.c.bf16 %v1779_v62, %v1771_v21  ;;  %1251 = vmatprep.mubr.f32.mxu0 %v1805_v6 }
 0x291   :  { %v1783_v0 = vpop.eup %1782  ;;  %v1576_v29 = vpack.c.bf16 %v1781_v20, %v1773_v26  ;;  %1492 = vmatmul.mubr.msk.f32.vlgmr.msra.gmra.mrb[32].mxu1 %vm215_vm0, %v2141_v60 }
 0x292   :  { %v1785_v28 = vpop.eup %1784  ;;  %v1586_v2 = vpack.c.bf16 %v1783_v0, %v1775_v57  ;;  %1322 = vmatprep.mubr.f32.mxu1 %v1805_v6  ;;  %v1802_v6 = vld [vmem:[%s2239_s0] sm:$0xff] }
 0x293   :  { %v1787_v35 = vpop.eup %1786  ;;  %1577 = vmatprep.subr.bf16.mxu0 %v1576_v29  ;;  %v1584_v3 = vpack.c.bf16 %v1785_v28, %v1777_v59  ;;  %v1329_v25 = vmul.f32 2.0, %v1802_v6  ;;  %v1384_v39 = vsub.f32 1.0, %v1802_v6 }
 0x294   :  { %v1789_v4 = vpop.eup %1788  ;;  %1579 = vmatpush1.bf16.msra.mxu0 %v1578_v63 }
 0x295   :  { %v1791_v5 = vpop.eup %1790  ;;  %1585 = vmatprep.subr.bf16.mxu1 %v1584_v3  ;;  %v1495_v1 = vadd.f32 -1.0, %v1329_v25  ;;  %v1385_v9 = vmul.f32 %v1802_v6, %v1384_v39 }
 0x296   :  { %v1793_v8 = vpop.eup %1792  ;;  %1587 = vmatpush1.bf16.msra.mxu1 %v1586_v2 }
 0x297   :  { %v1795_v12 = vpop.eup %1794  ;;  %v1335_v44 = vrot.slane %v1495_v1, %v1876_v13  ;;  %v1339_v31 = vrot.slane %v1495_v1, %v1869_v10  ;;  %v1390_v51 = vrot.slane %v1385_v9, %v1876_v13  ;;  %v1343_v32 = vrot.slane %v1495_v1, %v1878_v14 }
 0x298   :  { %v1797_v15 = vpop.eup %1796  ;;  %v1582_v16 = vpack.c.bf16 %v1795_v12, %v1787_v35  ;;  %v1347_v56 = vrot.slane %v1495_v1, %v1871_v11  ;;  %v1398_v7 = vrot.slane %v1385_v9, %v1878_v14  ;;  %v1402_v54 = vrot.slane %v1385_v9, %v1871_v11 }
 0x299   :  { %v1799_v17 = vpop.eup %1798  ;;  %v1580_v22 = vpack.c.bf16 %v1797_v15, %v1789_v4  ;;  %v1376_v37 = vmul.f32 %v1374_v18, %v1335_v44  ;;  %v1377_v41 = vmul.f32 %v1374_v18, %v1339_v31  ;;  %v1378_v21 = vmul.f32 %v1374_v18, %v1343_v32 }
 0x29a   :  { %v1801_v50 = vpop.eup %1800  ;;  %v1590_v23 = vpack.c.bf16 %v1799_v17, %v1791_v5  ;;  %v1379_v30 = vmul.f32 %v1374_v18, %v1347_v56  ;;  %v1351_v11 = vrot.slane %v1495_v1, %v1921_v43  ;;  %v1355_v58 = vrot.slane %v1495_v1, %v1886_v19 }
 0x29b   :  { %1581 = vmatprep.subr.bf16.mxu0 %v1580_v22  ;;  %v1588_v24 = vpack.c.bf16 %v1801_v50, %v1793_v8  ;;  %v1406_v27 = vrot.slane %v1385_v9, %v1921_v43  ;;  %v1359_v59 = vrot.slane %v1495_v1, %v1927_v46  ;;  %v1410_v62 = vrot.slane %v1385_v9, %v1886_v19 }
 0x29c   :  { %1583 = vmatpush1.bf16.msra.mxu0 %v1582_v16  ;;  %v1363_v20 = vrot.slane %v1495_v1, %v1925_v45  ;;  %v1380_v0 = vmul.f32 %v1374_v18, %v1351_v11  ;;  %v1414_v29 = vrot.slane %v1385_v9, %v1927_v46  ;;  %v1381_v3 = vmul.f32 %v1374_v18, %v1355_v58 }
 0x29d   :  { %1589 = vmatprep.subr.bf16.mxu1 %v1588_v24  ;;  %v1418_v4 = vrot.slane %v1385_v9, %v1925_v45  ;;  %v1382_v43 = vmul.f32 %v1374_v18, %v1359_v59 }
 0x29e   :  { %1591 = vmatpush1.bf16.msra.mxu1 %v1590_v23  ;;  %v1383_v17 = vmul.f32 %v1374_v18, %v1363_v20 }
 0x29f   :  { %1493 = vmatmul.mubr.msk.f32.vlgmr.msra.gmra.mrb[34].mxu0 %vm215_vm0, %v2141_v60 }
 0x2a1   :  { %1494 = vmatmul.mubr.msk.f32.vlgmr.msra.gmra.mrb[34].mxu1 %vm215_vm0, %v2141_v60  ;;  %v1394_v60 = vrot.slane %v1385_v9, %v1869_v10 }
 0x362   :  { %v1111_v33 = vpop.f32.mrb[32].mxu0 }
 0x363   :  { %v1112_v34 = vadd.f32 %v1111_v33, %v1041_v55  ;;  %v1113_v36 = vpop.f32.mrb[33].mxu0 }
 0x364   :  { %v1182_v38 = vpop.f32.mrb[32].mxu1  ;;  %v1114_v40 = vadd.f32 %v1113_v36, %v1041_v55 }
 0x365   :  { %v1183_v42 = vadd.f32 %v1182_v38, %v1041_v55  ;;  %v1427_v47 = vmul.f32 %v1390_v51, %v1112_v34  ;;  %v1184_v13 = vpop.f32.mrb[33].mxu1 }
 0x366   :  { %v1428_v48 = vmul.f32 %v1394_v60, %v1114_v40  ;;  %v1185_v49 = vadd.f32 %v1184_v13, %v1041_v55 }
 0x367   :  { %v1429_v10 = vmul.f32 %v1398_v7, %v1183_v42  ;;  %v1435_v26 = vadd.f32 %v1427_v47, %v1376_v37 }
 0x368   :  { %v1430_v52 = vmul.f32 %v1402_v54, %v1185_v49  ;;  %v1436_v53 = vadd.f32 %v1428_v48, %v1377_v41 }
 0x369   :  { %v1437_v57 = vadd.f32 %v1429_v10, %v1378_v21  ;;  %1443 = vst [vmem:[%s2242_s4] sm:$0xff] %v1435_v26 }
 0x36a   :  { %v1438_v14 = vadd.f32 %v1430_v52, %v1379_v30  ;;  %1444 = vst [vmem:[%s2242_s4 + $0x8] sm:$0xff] %v1436_v53 }
 0x36b   :  { %1445 = vst [vmem:[%s2242_s4 + $0x10] sm:$0xff] %v1437_v57 }
 0x36c   :  { %1446 = vst [vmem:[%s2242_s4 + $0x18] sm:$0xff] %v1438_v14 }
 0x372   :  { %v1253_v61 = vpop.f32.mrb[34].mxu0 }
 0x373   :  { %v1254_v63 = vadd.f32 %v1253_v61, %v1041_v55  ;;  %v1255_v28 = vpop.f32.mrb[35].mxu0 }
 0x374   :  { %v1324_v2 = vpop.f32.mrb[34].mxu1  ;;  %v1256_v35 = vadd.f32 %v1255_v28, %v1041_v55 }
 0x375   :  { %v1431_v5 = vmul.f32 %v1406_v27, %v1254_v63  ;;  %v1325_v8 = vadd.f32 %v1324_v2, %v1041_v55  ;;  %v1326_v12 = vpop.f32.mrb[35].mxu1 }
 0x376   :  { %v1432_v15 = vmul.f32 %v1410_v62, %v1256_v35  ;;  %v1327_v16 = vadd.f32 %v1326_v12, %v1041_v55 }
 0x377   :  { %v1439_v19 = vadd.f32 %v1431_v5, %v1380_v0  ;;  %v1433_v22 = vmul.f32 %v1414_v29, %v1325_v8 }
 0x378   :  { %v1440_v50 = vadd.f32 %v1432_v15, %v1381_v3  ;;  %v1434_v23 = vmul.f32 %v1418_v4, %v1327_v16 }
 0x379   :  { %1447 = vst [vmem:[%s2242_s4 + $0x20] sm:$0xff] %v1439_v19  ;;  %v1441_v46 = vadd.f32 %v1433_v22, %v1382_v43 }
 0x37a   :  { %1448 = vst [vmem:[%s2242_s4 + $0x28] sm:$0xff] %v1440_v50  ;;  %v1442_v45 = vadd.f32 %v1434_v23, %v1383_v17 }
 0x37b   :  { %1449 = vst [vmem:[%s2242_s4 + $0x30] sm:$0xff] %v1441_v46 }
 0x37c   :  { %1450 = vst [vmem:[%s2242_s4 + $0x38] sm:$0xff] %v1442_v45 }

</bundles_post_ra>
